<compile_context>
chip_gen: v7x
topology: tpu7x:2x2x1
jax: 0.10.0
libtpu: 0.0.40
codegen_flags: <defaults>
</compile_context>

<pallas_src>
import math
import functools

import jax
import jax.numpy as jnp
from jax.experimental import pallas as pl
from jax.experimental.pallas import tpu as pltpu  # noqa: F401  (TPU backend assumed)


# ----------------------------------------------------------------------------
# Plain-JAX glue: build_graph (metric='dots') + normalize_digraph
# ----------------------------------------------------------------------------
def build_graph_dots(x, neighbor_num):
    # x: (b, n, c) -- detached in PyTorch; pure function here.
    si = jnp.einsum('bic,bjc->bij', x, x)                       # (b, n, n)
    topk_vals = jax.lax.top_k(si, neighbor_num)[0]              # (b, n, k) desc
    threshold = topk_vals[..., -1:]                             # (b, n, 1)
    return (si >= threshold).astype(jnp.float32)


def normalize_digraph(A):
    # norm_A[b,i,j] = d_i^-1/2 * A[b,i,j] * d_j^-1/2
    deg = jnp.sum(A, axis=-1)                                   # (b, n)
    dinv = deg ** -0.5
    dinv = jnp.where(jnp.isinf(dinv), 0.0, dinv)
    return A * dinv[:, :, None] * dinv[:, None, :]


# ----------------------------------------------------------------------------
# Fused Pallas kernel (single invocation, whole batch)
# ----------------------------------------------------------------------------
def _make_kernel(c, nhead):
    hd = c // nhead
    scale = 1.0 / math.sqrt(hd)
    eps = 1e-5
    bf16 = jnp.bfloat16

    def layernorm(y, w, b):
        mu = jnp.mean(y, axis=-1, keepdims=True)
        var = jnp.mean((y - mu) ** 2, axis=-1, keepdims=True)
        return (y - mu) * jax.lax.rsqrt(var + eps) * w + b

    def kernel(x_ref, A_ref, W_ref, vec_ref, E_ref, Et_ref, hmask_ref,
               abias_ref, o_ref):
        x = x_ref[...]          # (B*N, C)        f32
        A = A_ref[...]          # (B*N, B*N)      f32  block-diagonal norm. adj
        vecs = vec_ref[...]     # (16, C)         f32  packed bias/affine rows
        E = E_ref[...]          # (B*H*N, B*N)    f32  0/1 row-replication
        Et = Et_ref[...]        # (B*N, B*H*N)    f32  its transpose (fold-back)
        hmask = hmask_ref[...]  # (B*H*N, C)      f32  per-head channel mask
        abias = abias_ref[...]  # (B*H*N, B*N)    f32  0 same batch / -1e9 cross

        def vrow(i):            # (1, C) row of the packed vector stack
            return vecs[i:i + 1, :]

        def mm(lhs, w_idx):     # bf16 MXU matmul, f32 accumulation
            return jnp.dot(lhs.astype(bf16), W_ref[w_idx],
                           preferred_element_type=jnp.float32)

        # ---- GCN core: res = A @ V(x) + U(x); BN (eval, folded); relu(x+res)
        Vx = mm(x, 1) + vrow(1)
        Ux = mm(x, 0) + vrow(0)
        agg = jnp.dot(A.astype(bf16), Vx.astype(bf16),
                      preferred_element_type=jnp.float32)
        res = (agg + Ux) * vrow(2) + vrow(3)
        x1 = jnp.maximum(x + res, 0.0)                          # (B*N, C)

        # ---- Multi-head self-attention (batch_first, eval) ----
        q = mm(x1, 2) + vrow(4)
        k = mm(x1, 3) + vrow(5)
        v = mm(x1, 4) + vrow(6)

        # Replicate q per (batch, head) row block and keep only that head's
        # channels; a full-C contraction against k then gives per-head scores.
        q_exp = jnp.dot(E, q, preferred_element_type=jnp.float32) * hmask
        s = jax.lax.dot_general(q_exp.astype(bf16), k.astype(bf16),
                                (((1,), (1,)), ((), ())),
                                preferred_element_type=jnp.float32)
        s = s * scale + abias                       # mask cross-batch attention
        m = jnp.max(s, axis=-1, keepdims=True)
        e = jnp.exp(s - m)
        p = e * pl.reciprocal(jnp.sum(e, axis=-1, keepdims=True), approx=True)
        ctx = jnp.dot(p.astype(bf16), v.astype(bf16),
                      preferred_element_type=jnp.float32)       # (B*H*N, C)
        # Fold the per-head row blocks back to (B*N, C): attn = E^T (ctx*hmask)
        attn = jnp.dot(Et, ctx * hmask, preferred_element_type=jnp.float32)
        attn = mm(attn, 5) + vrow(7)                            # out-proj

        x2 = layernorm(x1 + attn, vrow(10), vrow(11))

        # ---- Feed-forward block (Linear -> ReLU -> Linear) ----
        hid = jnp.maximum(mm(x2, 6) + vrow(8), 0.0)
        ff = mm(hid, 7) + vrow(9)
        x3 = layernorm(x2 + ff, vrow(12), vrow(13))

        o_ref[...] = x3
        # NOTE: output last dim = C (<128) -> masked stores; at these sizes an
        # in-kernel (B, N*C) reshape would cost more (relayout) than it saves.

    return kernel


def gcn_forward(x, A, w_stack, vec_stack, nhead=8):
    b, n, c = x.shape
    bn = b * n
    h = nhead
    hd = c // h

    # ---- structural constants built in the wrapper (tiny, shape-only) ----
    # Block-diagonal normalized adjacency: (B*N, B*N).
    A_bd = (jnp.eye(b, dtype=A.dtype)[:, None, :, None]
            * A[:, :, None, :]).reshape(bn, bn)

    # Expanded attention row r indexes (batch rb, head rh, node rn).
    r = jnp.arange(b * h * n)
    rb = r // (h * n)
    rh = (r // n) % h
    rn = r % n
    # 0/1 replication matrix and its transpose (fold-back).
    E = jax.nn.one_hot(rb * n + rn, bn, dtype=jnp.float32)      # (B*H*N, B*N)
    Et = E.T                                                    # (B*N, B*H*N)
    # Per-head channel mask.
    ch = jnp.arange(c)
    hmask = ((ch[None, :] >= rh[:, None] * hd)
             & (ch[None, :] < (rh[:, None] + 1) * hd)).astype(jnp.float32)
    # Cross-batch additive attention bias.
    cb = jnp.arange(bn) // n
    abias = jnp.where(rb[:, None] == cb[None, :], 0.0, -1e9).astype(jnp.float32)

    kernel = _make_kernel(c, nhead)
    out = pl.pallas_call(
        kernel,
        out_shape=jax.ShapeDtypeStruct((bn, c), jnp.float32),
    )(x.reshape(bn, c), A_bd, w_stack, vec_stack, E, Et, hmask, abias)
    return out.reshape(b, n, c)


# ----------------------------------------------------------------------------
# Deterministic parameter construction (shapes from GCN.__init__ / FFN / MHA)
# ----------------------------------------------------------------------------
def init_params(key, c, nhead=8):
    ks = jax.random.split(key, 10)
    std = math.sqrt(2.0 / c)
    bnd = 1.0 / math.sqrt(c)
    eps = 1e-5

    # U, V : nn.Linear(c, c). PyTorch weight is (out, in) -> store transposed.
    Uw = (std * jax.random.normal(ks[0], (c, c))).T
    Ub = jax.random.uniform(ks[1], (c,), minval=-bnd, maxval=bnd)
    Vw = (std * jax.random.normal(ks[2], (c, c))).T
    Vb = jax.random.uniform(ks[3], (c,), minval=-bnd, maxval=bnd)

    # BatchNorm1d(c) eval: weight=1, bias=0, running stats (0,1) -> folded.
    bn_scale = jnp.full((c,), 1.0 / math.sqrt(1.0 + eps), jnp.float32)
    bn_shift = jnp.zeros((c,), jnp.float32)

    # MultiheadAttention(c, nhead): in_proj (3c, c) split into Wq/Wk/Wv,
    # zero in-proj / out-proj biases (PyTorch default init).
    Win = 0.1 * jax.random.normal(ks[4], (3 * c, c))
    Wq, Wk, Wv = Win[0 * c:1 * c].T, Win[1 * c:2 * c].T, Win[2 * c:3 * c].T
    bq = bk = bv = jnp.zeros((c,), jnp.float32)
    Wout = (0.1 * jax.random.normal(ks[5], (c, c))).T
    outb = jnp.zeros((c,), jnp.float32)

    # FFN linear1/linear2 : Linear(c, c) (dim_feedforward == c in the module).
    W1 = jax.random.uniform(ks[6], (c, c), minval=-bnd, maxval=bnd).T
    b1 = jax.random.uniform(ks[7], (c,), minval=-bnd, maxval=bnd)
    W2 = jax.random.uniform(ks[8], (c, c), minval=-bnd, maxval=bnd).T
    b2 = jax.random.uniform(ks[9], (c,), minval=-bnd, maxval=bnd)

    # LayerNorms: weight=1, bias=0.
    ln1w, ln1b = jnp.ones((c,)), jnp.zeros((c,))
    ln2w, ln2b = jnp.ones((c,)), jnp.zeros((c,))

    # Pack: one bf16 weight stack (one DMA, bf16 MXU operands) ...
    w_stack = jnp.stack([Uw, Vw, Wq, Wk, Wv, Wout, W1, W2]).astype(jnp.bfloat16)
    # ... and one f32 vector stack (16, c); rows 14-15 are sublane padding.
    vec_stack = jnp.stack(
        [Ub, Vb, bn_scale, bn_shift, bq, bk, bv, outb, b1, b2,
         ln1w, ln1b, ln2w, ln2b, jnp.zeros((c,)), jnp.zeros((c,))]
    ).astype(jnp.float32)
    return w_stack, vec_stack


if __name__ == "__main__":
    b, n, c = 2, 8, 32          # batch, graph nodes, in_channels (nhead=8)
    neighbor_num = 3
    nhead = 8

    key = jax.random.PRNGKey(0)
    kx, kp = jax.random.split(key)
    x = jax.random.normal(kx, (b, n, c), jnp.float32)
    w_stack, vec_stack = init_params(kp, c, nhead)

    # Graph construction (metric='dots') + digraph normalization (glue).
    adj = build_graph_dots(x, neighbor_num)
    A = normalize_digraph(adj)

    fwd = jax.jit(functools.partial(gcn_forward, nhead=nhead))
    out = fwd(x, A, w_stack, vec_stack)
    out = jax.block_until_ready(out)

    assert out.shape == (b, n, c)
    assert bool(jnp.all(jnp.isfinite(out)))
    print("KERNEL_OK")
</pallas_src>

<mosaic_0001>
module attributes {stable_mosaic.version = 11 : i64} {
  func.func @kernel(%arg0: memref<16x32xf32, #tpu.memory_space<vmem>>, %arg1: memref<16x16xf32, #tpu.memory_space<vmem>>, %arg2: memref<8x32x32xbf16, #tpu.memory_space<vmem>>, %arg3: memref<16x32xf32, #tpu.memory_space<vmem>>, %arg4: memref<128x16xf32, #tpu.memory_space<vmem>>, %arg5: memref<16x128xf32, #tpu.memory_space<vmem>>, %arg6: memref<128x32xf32, #tpu.memory_space<vmem>>, %arg7: memref<128x16xf32, #tpu.memory_space<vmem>>, %arg8: memref<16x32xf32, #tpu.memory_space<vmem>>) attributes {dimension_semantics = [], scalar_prefetch = 0 : i64, scratch_operands = 0 : i64, tpu.core_type = #tpu.core_type<tc>} {
    %c0 = arith.constant 0 : index
    %c0_0 = arith.constant 0 : index
    %0 = vector.load %arg0[%c0, %c0_0] : memref<16x32xf32, #tpu.memory_space<vmem>>, vector<16x32xf32>
    %c0_1 = arith.constant 0 : index
    %c0_2 = arith.constant 0 : index
    %1 = vector.load %arg1[%c0_1, %c0_2] : memref<16x16xf32, #tpu.memory_space<vmem>>, vector<16x16xf32>
    %c0_3 = arith.constant 0 : index
    %c0_4 = arith.constant 0 : index
    %2 = vector.load %arg3[%c0_3, %c0_4] : memref<16x32xf32, #tpu.memory_space<vmem>>, vector<16x32xf32>
    %c0_5 = arith.constant 0 : index
    %c0_6 = arith.constant 0 : index
    %3 = vector.load %arg4[%c0_5, %c0_6] : memref<128x16xf32, #tpu.memory_space<vmem>>, vector<128x16xf32>
    %c0_7 = arith.constant 0 : index
    %c0_8 = arith.constant 0 : index
    %4 = vector.load %arg5[%c0_7, %c0_8] : memref<16x128xf32, #tpu.memory_space<vmem>>, vector<16x128xf32>
    %c0_9 = arith.constant 0 : index
    %c0_10 = arith.constant 0 : index
    %5 = vector.load %arg6[%c0_9, %c0_10] : memref<128x32xf32, #tpu.memory_space<vmem>>, vector<128x32xf32>
    %c0_11 = arith.constant 0 : index
    %c0_12 = arith.constant 0 : index
    %6 = vector.load %arg7[%c0_11, %c0_12] : memref<128x16xf32, #tpu.memory_space<vmem>>, vector<128x16xf32>
    %7 = arith.truncf %0 : vector<16x32xf32> to vector<16x32xbf16>
    %c1 = arith.constant 1 : index
    %c0_13 = arith.constant 0 : index
    %c0_14 = arith.constant 0 : index
    %8 = vector.load %arg2[%c1, %c0_13, %c0_14] : memref<8x32x32xbf16, #tpu.memory_space<vmem>>, vector<1x32x32xbf16>
    %9 = vector.shape_cast %8 : vector<1x32x32xbf16> to vector<32x32xbf16>
    %cst = arith.constant dense<0.000000e+00> : vector<16x32xf32>
    %10 = tpu.matmul %7, %9, %cst {dimension_numbers = #tpu.dot_dimension_numbers<[1], [0], [0], [1], [0, 0, 1, 1], [], []>} : vector<16x32xbf16>, vector<32x32xbf16>, vector<16x32xf32> -> vector<16x32xf32>
    %11 = vector.extract_strided_slice %2 {offsets = [1, 0], sizes = [1, 32], strides = [1, 1]} : vector<16x32xf32> to vector<1x32xf32>
    %12 = vector.broadcast %11 : vector<1x32xf32> to vector<16x32xf32>
    %13 = arith.addf %10, %12 : vector<16x32xf32>
    %14 = arith.truncf %0 : vector<16x32xf32> to vector<16x32xbf16>
    %c0_15 = arith.constant 0 : index
    %c0_16 = arith.constant 0 : index
    %c0_17 = arith.constant 0 : index
    %15 = vector.load %arg2[%c0_15, %c0_16, %c0_17] : memref<8x32x32xbf16, #tpu.memory_space<vmem>>, vector<1x32x32xbf16>
    %16 = vector.shape_cast %15 : vector<1x32x32xbf16> to vector<32x32xbf16>
    %cst_18 = arith.constant dense<0.000000e+00> : vector<16x32xf32>
    %17 = tpu.matmul %14, %16, %cst_18 {dimension_numbers = #tpu.dot_dimension_numbers<[1], [0], [0], [1], [0, 0, 1, 1], [], []>} : vector<16x32xbf16>, vector<32x32xbf16>, vector<16x32xf32> -> vector<16x32xf32>
    %18 = vector.extract_strided_slice %2 {offsets = [0, 0], sizes = [1, 32], strides = [1, 1]} : vector<16x32xf32> to vector<1x32xf32>
    %19 = vector.broadcast %18 : vector<1x32xf32> to vector<16x32xf32>
    %20 = arith.addf %17, %19 : vector<16x32xf32>
    %21 = arith.truncf %1 : vector<16x16xf32> to vector<16x16xbf16>
    %22 = arith.truncf %13 : vector<16x32xf32> to vector<16x32xbf16>
    %cst_19 = arith.constant dense<0.000000e+00> : vector<16x32xf32>
    %23 = tpu.matmul %21, %22, %cst_19 {dimension_numbers = #tpu.dot_dimension_numbers<[1], [0], [0], [1], [0, 0, 1, 1], [], []>} : vector<16x16xbf16>, vector<16x32xbf16>, vector<16x32xf32> -> vector<16x32xf32>
    %24 = arith.addf %23, %20 : vector<16x32xf32>
    %25 = vector.extract_strided_slice %2 {offsets = [2, 0], sizes = [1, 32], strides = [1, 1]} : vector<16x32xf32> to vector<1x32xf32>
    %26 = vector.broadcast %25 : vector<1x32xf32> to vector<16x32xf32>
    %27 = arith.mulf %24, %26 : vector<16x32xf32>
    %28 = vector.extract_strided_slice %2 {offsets = [3, 0], sizes = [1, 32], strides = [1, 1]} : vector<16x32xf32> to vector<1x32xf32>
    %29 = vector.broadcast %28 : vector<1x32xf32> to vector<16x32xf32>
    %30 = arith.addf %27, %29 : vector<16x32xf32>
    %31 = arith.addf %0, %30 : vector<16x32xf32>
    %cst_20 = arith.constant 0.000000e+00 : f32
    %32 = vector.broadcast %cst_20 : f32 to vector<16x32xf32>
    %33 = arith.maximumf %31, %32 : vector<16x32xf32>
    %34 = arith.truncf %33 : vector<16x32xf32> to vector<16x32xbf16>
    %c2 = arith.constant 2 : index
    %c0_21 = arith.constant 0 : index
    %c0_22 = arith.constant 0 : index
    %35 = vector.load %arg2[%c2, %c0_21, %c0_22] : memref<8x32x32xbf16, #tpu.memory_space<vmem>>, vector<1x32x32xbf16>
    %36 = vector.shape_cast %35 : vector<1x32x32xbf16> to vector<32x32xbf16>
    %cst_23 = arith.constant dense<0.000000e+00> : vector<16x32xf32>
    %37 = tpu.matmul %34, %36, %cst_23 {dimension_numbers = #tpu.dot_dimension_numbers<[1], [0], [0], [1], [0, 0, 1, 1], [], []>} : vector<16x32xbf16>, vector<32x32xbf16>, vector<16x32xf32> -> vector<16x32xf32>
    %38 = vector.extract_strided_slice %2 {offsets = [4, 0], sizes = [1, 32], strides = [1, 1]} : vector<16x32xf32> to vector<1x32xf32>
    %39 = vector.broadcast %38 : vector<1x32xf32> to vector<16x32xf32>
    %40 = arith.addf %37, %39 : vector<16x32xf32>
    %41 = arith.truncf %33 : vector<16x32xf32> to vector<16x32xbf16>
    %c3 = arith.constant 3 : index
    %c0_24 = arith.constant 0 : index
    %c0_25 = arith.constant 0 : index
    %42 = vector.load %arg2[%c3, %c0_24, %c0_25] : memref<8x32x32xbf16, #tpu.memory_space<vmem>>, vector<1x32x32xbf16>
    %43 = vector.shape_cast %42 : vector<1x32x32xbf16> to vector<32x32xbf16>
    %cst_26 = arith.constant dense<0.000000e+00> : vector<16x32xf32>
    %44 = tpu.matmul %41, %43, %cst_26 {dimension_numbers = #tpu.dot_dimension_numbers<[1], [0], [0], [1], [0, 0, 1, 1], [], []>} : vector<16x32xbf16>, vector<32x32xbf16>, vector<16x32xf32> -> vector<16x32xf32>
    %45 = vector.extract_strided_slice %2 {offsets = [5, 0], sizes = [1, 32], strides = [1, 1]} : vector<16x32xf32> to vector<1x32xf32>
    %46 = vector.broadcast %45 : vector<1x32xf32> to vector<16x32xf32>
    %47 = arith.addf %44, %46 : vector<16x32xf32>
    %48 = arith.truncf %33 : vector<16x32xf32> to vector<16x32xbf16>
    %c4 = arith.constant 4 : index
    %c0_27 = arith.constant 0 : index
    %c0_28 = arith.constant 0 : index
    %49 = vector.load %arg2[%c4, %c0_27, %c0_28] : memref<8x32x32xbf16, #tpu.memory_space<vmem>>, vector<1x32x32xbf16>
    %50 = vector.shape_cast %49 : vector<1x32x32xbf16> to vector<32x32xbf16>
    %cst_29 = arith.constant dense<0.000000e+00> : vector<16x32xf32>
    %51 = tpu.matmul %48, %50, %cst_29 {dimension_numbers = #tpu.dot_dimension_numbers<[1], [0], [0], [1], [0, 0, 1, 1], [], []>} : vector<16x32xbf16>, vector<32x32xbf16>, vector<16x32xf32> -> vector<16x32xf32>
    %52 = vector.extract_strided_slice %2 {offsets = [6, 0], sizes = [1, 32], strides = [1, 1]} : vector<16x32xf32> to vector<1x32xf32>
    %53 = vector.broadcast %52 : vector<1x32xf32> to vector<16x32xf32>
    %54 = arith.addf %51, %53 : vector<16x32xf32>
    %cst_30 = arith.constant dense<0.000000e+00> : vector<128x32xf32>
    %55 = tpu.matmul %3, %40, %cst_30 {dimension_numbers = #tpu.dot_dimension_numbers<[1], [0], [0], [1], [0, 0, 1, 1], [], []>} : vector<128x16xf32>, vector<16x32xf32>, vector<128x32xf32> -> vector<128x32xf32>
    %56 = arith.mulf %55, %5 : vector<128x32xf32>
    %57 = arith.truncf %56 : vector<128x32xf32> to vector<128x32xbf16>
    %58 = arith.truncf %47 : vector<16x32xf32> to vector<16x32xbf16>
    %cst_31 = arith.constant dense<0.000000e+00> : vector<128x16xf32>
    %59 = tpu.matmul %57, %58, %cst_31 {dimension_numbers = #tpu.dot_dimension_numbers<[1], [1], [0], [0], [0, 0, 1, 0], [], []>} : vector<128x32xbf16>, vector<16x32xbf16>, vector<128x16xf32> -> vector<128x16xf32>
    %cst_32 = arith.constant 5.000000e-01 : f32
    %60 = vector.broadcast %cst_32 : f32 to vector<128x16xf32>
    %61 = arith.mulf %59, %60 : vector<128x16xf32>
    %62 = arith.addf %61, %6 : vector<128x16xf32>
    %cst_33 = arith.constant dense<0xFF800000> : vector<128xf32>
    %63 = vector.multi_reduction <maximumf>, %62, %cst_33 [1] : vector<128x16xf32> to vector<128xf32>
    %64 = vector.shape_cast %63 : vector<128xf32> to vector<128x1xf32>
    %65 = vector.broadcast %64 : vector<128x1xf32> to vector<128x16xf32>
    %66 = arith.subf %62, %65 : vector<128x16xf32>
    %67 = math.exp %66 : vector<128x16xf32>
    %cst_34 = arith.constant dense<0.000000e+00> : vector<128xf32>
    %68 = vector.multi_reduction <add>, %67, %cst_34 [1] : vector<128x16xf32> to vector<128xf32>
    %69 = vector.shape_cast %68 : vector<128xf32> to vector<128x1xf32>
    %70 = tpu.reciprocal %69 {approx = true} : vector<128x1xf32> -> vector<128x1xf32>
    %71 = vector.broadcast %70 : vector<128x1xf32> to vector<128x16xf32>
    %72 = arith.mulf %67, %71 : vector<128x16xf32>
    %73 = arith.truncf %72 : vector<128x16xf32> to vector<128x16xbf16>
    %74 = arith.truncf %54 : vector<16x32xf32> to vector<16x32xbf16>
    %cst_35 = arith.constant dense<0.000000e+00> : vector<128x32xf32>
    %75 = tpu.matmul %73, %74, %cst_35 {dimension_numbers = #tpu.dot_dimension_numbers<[1], [0], [0], [1], [0, 0, 1, 1], [], []>} : vector<128x16xbf16>, vector<16x32xbf16>, vector<128x32xf32> -> vector<128x32xf32>
    %76 = arith.mulf %75, %5 : vector<128x32xf32>
    %cst_36 = arith.constant dense<0.000000e+00> : vector<16x32xf32>
    %77 = tpu.matmul %4, %76, %cst_36 {dimension_numbers = #tpu.dot_dimension_numbers<[1], [0], [0], [1], [0, 0, 1, 1], [], []>} : vector<16x128xf32>, vector<128x32xf32>, vector<16x32xf32> -> vector<16x32xf32>
    %78 = arith.truncf %77 : vector<16x32xf32> to vector<16x32xbf16>
    %c5 = arith.constant 5 : index
    %c0_37 = arith.constant 0 : index
    %c0_38 = arith.constant 0 : index
    %79 = vector.load %arg2[%c5, %c0_37, %c0_38] : memref<8x32x32xbf16, #tpu.memory_space<vmem>>, vector<1x32x32xbf16>
    %80 = vector.shape_cast %79 : vector<1x32x32xbf16> to vector<32x32xbf16>
    %cst_39 = arith.constant dense<0.000000e+00> : vector<16x32xf32>
    %81 = tpu.matmul %78, %80, %cst_39 {dimension_numbers = #tpu.dot_dimension_numbers<[1], [0], [0], [1], [0, 0, 1, 1], [], []>} : vector<16x32xbf16>, vector<32x32xbf16>, vector<16x32xf32> -> vector<16x32xf32>
    %82 = vector.extract_strided_slice %2 {offsets = [7, 0], sizes = [1, 32], strides = [1, 1]} : vector<16x32xf32> to vector<1x32xf32>
    %83 = vector.broadcast %82 : vector<1x32xf32> to vector<16x32xf32>
    %84 = arith.addf %81, %83 : vector<16x32xf32>
    %85 = arith.addf %33, %84 : vector<16x32xf32>
    %86 = vector.extract_strided_slice %2 {offsets = [10, 0], sizes = [1, 32], strides = [1, 1]} : vector<16x32xf32> to vector<1x32xf32>
    %87 = vector.extract_strided_slice %2 {offsets = [11, 0], sizes = [1, 32], strides = [1, 1]} : vector<16x32xf32> to vector<1x32xf32>
    %cst_40 = arith.constant dense<0.000000e+00> : vector<16xf32>
    %88 = vector.multi_reduction <add>, %85, %cst_40 [1] : vector<16x32xf32> to vector<16xf32>
    %89 = vector.shape_cast %88 : vector<16xf32> to vector<16x1xf32>
    %cst_41 = arith.constant 3.200000e+01 : f32
    %90 = vector.broadcast %cst_41 : f32 to vector<16x1xf32>
    %91 = arith.divf %89, %90 : vector<16x1xf32>
    %92 = vector.broadcast %91 : vector<16x1xf32> to vector<16x32xf32>
    %93 = arith.subf %85, %92 : vector<16x32xf32>
    %94 = arith.mulf %93, %93 : vector<16x32xf32>
    %cst_42 = arith.constant dense<0.000000e+00> : vector<16xf32>
    %95 = vector.multi_reduction <add>, %94, %cst_42 [1] : vector<16x32xf32> to vector<16xf32>
    %96 = vector.shape_cast %95 : vector<16xf32> to vector<16x1xf32>
    %cst_43 = arith.constant 3.200000e+01 : f32
    %97 = vector.broadcast %cst_43 : f32 to vector<16x1xf32>
    %98 = arith.divf %96, %97 : vector<16x1xf32>
    %99 = vector.broadcast %91 : vector<16x1xf32> to vector<16x32xf32>
    %100 = arith.subf %85, %99 : vector<16x32xf32>
    %cst_44 = arith.constant 9.99999974E-6 : f32
    %101 = vector.broadcast %cst_44 : f32 to vector<16x1xf32>
    %102 = arith.addf %98, %101 : vector<16x1xf32>
    %103 = math.rsqrt %102 : vector<16x1xf32>
    %104 = vector.broadcast %103 : vector<16x1xf32> to vector<16x32xf32>
    %105 = arith.mulf %100, %104 : vector<16x32xf32>
    %106 = vector.broadcast %86 : vector<1x32xf32> to vector<16x32xf32>
    %107 = arith.mulf %105, %106 : vector<16x32xf32>
    %108 = vector.broadcast %87 : vector<1x32xf32> to vector<16x32xf32>
    %109 = arith.addf %107, %108 : vector<16x32xf32>
    %110 = arith.truncf %109 : vector<16x32xf32> to vector<16x32xbf16>
    %c6 = arith.constant 6 : index
    %c0_45 = arith.constant 0 : index
    %c0_46 = arith.constant 0 : index
    %111 = vector.load %arg2[%c6, %c0_45, %c0_46] : memref<8x32x32xbf16, #tpu.memory_space<vmem>>, vector<1x32x32xbf16>
    %112 = vector.shape_cast %111 : vector<1x32x32xbf16> to vector<32x32xbf16>
    %cst_47 = arith.constant dense<0.000000e+00> : vector<16x32xf32>
    %113 = tpu.matmul %110, %112, %cst_47 {dimension_numbers = #tpu.dot_dimension_numbers<[1], [0], [0], [1], [0, 0, 1, 1], [], []>} : vector<16x32xbf16>, vector<32x32xbf16>, vector<16x32xf32> -> vector<16x32xf32>
    %114 = vector.extract_strided_slice %2 {offsets = [8, 0], sizes = [1, 32], strides = [1, 1]} : vector<16x32xf32> to vector<1x32xf32>
    %115 = vector.broadcast %114 : vector<1x32xf32> to vector<16x32xf32>
    %116 = arith.addf %113, %115 : vector<16x32xf32>
    %cst_48 = arith.constant 0.000000e+00 : f32
    %117 = vector.broadcast %cst_48 : f32 to vector<16x32xf32>
    %118 = arith.maximumf %116, %117 : vector<16x32xf32>
    %119 = arith.truncf %118 : vector<16x32xf32> to vector<16x32xbf16>
    %c7 = arith.constant 7 : index
    %c0_49 = arith.constant 0 : index
    %c0_50 = arith.constant 0 : index
    %120 = vector.load %arg2[%c7, %c0_49, %c0_50] : memref<8x32x32xbf16, #tpu.memory_space<vmem>>, vector<1x32x32xbf16>
    %121 = vector.shape_cast %120 : vector<1x32x32xbf16> to vector<32x32xbf16>
    %cst_51 = arith.constant dense<0.000000e+00> : vector<16x32xf32>
    %122 = tpu.matmul %119, %121, %cst_51 {dimension_numbers = #tpu.dot_dimension_numbers<[1], [0], [0], [1], [0, 0, 1, 1], [], []>} : vector<16x32xbf16>, vector<32x32xbf16>, vector<16x32xf32> -> vector<16x32xf32>
    %123 = vector.extract_strided_slice %2 {offsets = [9, 0], sizes = [1, 32], strides = [1, 1]} : vector<16x32xf32> to vector<1x32xf32>
    %124 = vector.broadcast %123 : vector<1x32xf32> to vector<16x32xf32>
    %125 = arith.addf %122, %124 : vector<16x32xf32>
    %126 = arith.addf %109, %125 : vector<16x32xf32>
    %127 = vector.extract_strided_slice %2 {offsets = [12, 0], sizes = [1, 32], strides = [1, 1]} : vector<16x32xf32> to vector<1x32xf32>
    %128 = vector.extract_strided_slice %2 {offsets = [13, 0], sizes = [1, 32], strides = [1, 1]} : vector<16x32xf32> to vector<1x32xf32>
    %cst_52 = arith.constant dense<0.000000e+00> : vector<16xf32>
    %129 = vector.multi_reduction <add>, %126, %cst_52 [1] : vector<16x32xf32> to vector<16xf32>
    %130 = vector.shape_cast %129 : vector<16xf32> to vector<16x1xf32>
    %cst_53 = arith.constant 3.200000e+01 : f32
    %131 = vector.broadcast %cst_53 : f32 to vector<16x1xf32>
    %132 = arith.divf %130, %131 : vector<16x1xf32>
    %133 = vector.broadcast %132 : vector<16x1xf32> to vector<16x32xf32>
    %134 = arith.subf %126, %133 : vector<16x32xf32>
    %135 = arith.mulf %134, %134 : vector<16x32xf32>
    %cst_54 = arith.constant dense<0.000000e+00> : vector<16xf32>
    %136 = vector.multi_reduction <add>, %135, %cst_54 [1] : vector<16x32xf32> to vector<16xf32>
    %137 = vector.shape_cast %136 : vector<16xf32> to vector<16x1xf32>
    %cst_55 = arith.constant 3.200000e+01 : f32
    %138 = vector.broadcast %cst_55 : f32 to vector<16x1xf32>
    %139 = arith.divf %137, %138 : vector<16x1xf32>
    %140 = vector.broadcast %132 : vector<16x1xf32> to vector<16x32xf32>
    %141 = arith.subf %126, %140 : vector<16x32xf32>
    %cst_56 = arith.constant 9.99999974E-6 : f32
    %142 = vector.broadcast %cst_56 : f32 to vector<16x1xf32>
    %143 = arith.addf %139, %142 : vector<16x1xf32>
    %144 = math.rsqrt %143 : vector<16x1xf32>
    %145 = vector.broadcast %144 : vector<16x1xf32> to vector<16x32xf32>
    %146 = arith.mulf %141, %145 : vector<16x32xf32>
    %147 = vector.broadcast %127 : vector<1x32xf32> to vector<16x32xf32>
    %148 = arith.mulf %146, %147 : vector<16x32xf32>
    %149 = vector.broadcast %128 : vector<1x32xf32> to vector<16x32xf32>
    %150 = arith.addf %148, %149 : vector<16x32xf32>
    %c0_57 = arith.constant 0 : index
    %c0_58 = arith.constant 0 : index
    %151 = vector.load %arg8[%c0_57, %c0_58] : memref<16x32xf32, #tpu.memory_space<vmem>>, vector<16x32xf32>
    tpu.vector_store %arg8[%c0_57, %c0_58], %150 {strides = array<i32>} : memref<16x32xf32, #tpu.memory_space<vmem>>, vector<16x32xf32>,
    return
  }
}

</mosaic_0001>

<bundles_post_ra>
// kernel: gcn_forward.1
= control target key start
LH: loop header
LB: loop body
LE: loop exit
PB: predicated region body
PF: predicated region fallthrough
CT: control target
= control target key end

     0   :  { %v2033_v1 = vmov 0.0   ;;  %vm2034_vm0 = vmmov 0   ;;  %vm109_vm1 = vcmask 261120   ;;  %s2699_s0 = inlined_call_operand.vmem [shape: f32[16,32], index: 0, kind: input, shape index: {}]   ;;  %s2700_s1 = inlined_call_operand.vmem [shape: f32[16,16], index: 1, kind: input, shape index: {}]   ;;  %s2701_s2 = inlined_call_operand.vmem [shape: bf16[8,32,32], index: 2, kind: input, shape index: {}]   ;;  %s2702_s3 = inlined_call_operand.vmem [shape: f32[16,32], index: 3, kind: input, shape index: {}]   ;;  %s2703_s4 = inlined_call_operand.vmem [shape: f32[128,16], index: 4, kind: input, shape index: {}]   ;;  %s2704_s5 = inlined_call_operand.vmem [shape: f32[16,128], index: 5, kind: input, shape index: {}]   ;;  %s2705_s6 = inlined_call_operand.vmem [shape: f32[128,32], index: 6, kind: input, shape index: {}]   ;;  %s2706_s7 = inlined_call_operand.vmem [shape: f32[128,16], index: 7, kind: input, shape index: {}]   ;;  %s2707_s8 = inlined_call_operand.hbm [shape: f32[16,32], index: 8, kind: output, shape index: {}]  }
   0x1   :  { %v1920_v0 = vld [vmem:[%s2701_s2 + $0x10] sm:$0xff]   ;;  %1703 = vmatprep.subr.bf16.mxu0 %v2033_v1  ;;  %v1921_v2 = vld [vmem:[%s2701_s2 + $0x18] sm:$0xff]   ;;  %1711 = vmatprep.subr.bf16.mxu1 %v2033_v1  ;;  %v2096_v3 = vld [vmem:[%s2699_s0] sm:$0xff] }
   0x2   :  { %1704 = vmatpush3.bf16.msra.mxu0 %v1920_v0  ;;  %1707 = vmatprep.mubr.msk.bf16.mxu0 %vm2034_vm0, %v2033_v1  ;;  %v2101_v4 = vld [vmem:[%s2699_s0 + $0x8] sm:$0xff]  ;;  %v1922_v5 = vld [vmem:[%s2701_s2] sm:$0xff]  }
   0x3   :  { %1705 = vmatprep.subr.bf16.mxu0 %v2033_v1  ;;  %1715 = vmatprep.mubr.msk.bf16.mxu1 %vm2034_vm0, %v2033_v1  ;;  %v1923_v6 = vld [vmem:[%s2701_s2 + $0x8] sm:$0xff]   ;;  %v87_v7 = vpack.c.bf16 %v2101_v4, %v2096_v3 }
   0x4   :  { %1712 = vmatpush3.bf16.msra.mxu1 %v1922_v5 }
   0x5   :  { %1713 = vmatprep.subr.bf16.mxu1 %v2033_v1 }
   0x6   :  { %1706 = vmatpush3.bf16.msra.mxu0 %v1921_v2 }
   0x7   :  { %1725 = vmatprep.subr.bf16.mxu0 %v2033_v1 }
   0x8   :  { %1714 = vmatpush3.bf16.msra.mxu1 %v1923_v6 }
   0x9   :  { %1708 = vmatmul.mubr.msk.bf16.vlgmr.msra.gmra.mrb[0].mxu0 %vm109_vm1, %v87_v7  ;;  %1719 = vmatprep.subr.bf16.mxu1 %v2033_v1 }
   0xa   :  { %1729 = vmatprep.mubr.msk.bf16.mxu0 %vm2034_vm0, %v2033_v1 }
   0xb   :  { %1716 = vmatmul.mubr.msk.bf16.vlgmr.msra.gmra.mrb[0].mxu1 %vm109_vm1, %v87_v7 }
   0xc   :  { %1721 = vmatprep.mubr.msk.bf16.mxu1 %vm2034_vm0, %v2033_v1 }
   0xd   :  { %13 = vsyncpa [#allocation3], 0  ;;  %v93_v8 = vlaneseq  ;;  %v2129_v11 = vld [vmem:[%s2702_s3] sm:$0xff]  ;;  %v34_v20 = vld [vmem:[%s2700_s1 + $0x8] sm:$0xff]  ;;  %vm217_vm2 = vcmask 130048  }
   0xe   :  { %v33_v19 = vld [vmem:[%s2700_s1] sm:$0xff]  ;;  %v1926_v25 = vld [vmem:[%s2701_s2 + $0x28] sm:$0xff]   ;;  %v1928_v47 = vld [vmem:[%s2701_s2 + $0x30] sm:$0xff]  }
   0xf   :  { %v2123_v9 = vshrl.u32 %v93_v8, 7  ;;  %v215_v22 = vpack.c.bf16 %v34_v20, %v33_v19  ;;  %v1924_v23 = vld [vmem:[%s2701_s2 + $0x20] sm:$0xff]   ;;  %v1927_v26 = vld [vmem:[%s2701_s2 + $0x48] sm:$0xff]   ;;  %v1929_v49 = vld [vmem:[%s2701_s2 + $0x38] sm:$0xff]  }
  0x10   :  { %v1925_v24 = vld [vmem:[%s2701_s2 + $0x40] sm:$0xff]   ;;  %1726 = vmatpush3.bf16.msra.mxu0 %v1924_v23  ;;  %v43_v23 = vld [vmem:[%s2703_s4 + $0x30] sm:$0xff] }
  0x11   :  { %v95_v10 = vsub.s32 1, %v2123_v9  ;;  %1727 = vmatprep.subr.bf16.mxu0 %v2033_v1  ;;  %v160_v27 = vsub.s32 0, %v2123_v9  ;;  %v264_v28 = vsub.s32 2, %v2123_v9  ;;  %v270_v30 = vsub.s32 3, %v2123_v9  ;;  %v37_v50 = vld [vmem:[%s2703_s4] sm:$0xff] }
  0x12   :  { %v286_v51 = vsub.s32 4, %v2123_v9  ;;  %v413_v52 = vsub.s32 6, %v2123_v9  ;;  %v351_v61 = vsub.s32 5, %v2123_v9  ;;  %v41_v20 = vld [vmem:[%s2703_s4 + $0x20] sm:$0xff] }
  0x13   :  { %v96_v12 = vrot.slane %v2129_v11, %v95_v10  ;;  %v161_v29 = vrot.slane %v2129_v11, %v160_v27  ;;  %v265_v31 = vrot.slane %v2129_v11, %v264_v28  ;;  %v271_v34 = vrot.slane %v2129_v11, %v270_v30 }
  0x14   :  { %1728 = vmatpush3.bf16.msra.mxu0 %v1926_v25  ;;  %v287_v53 = vrot.slane %v2129_v11, %v286_v51  ;;  %v414_v54 = vrot.slane %v2129_v11, %v413_v52  ;;  %v352_v7 = vrot.slane %v2129_v11, %v351_v61  ;;  %v40_v11 = vld [vmem:[%s2703_s4 + $0x18] sm:$0xff]  ;;  %v45_v25 = vld [vmem:[%s2703_s4 + $0x40] sm:$0xff] }
  0x15   :  { %1733 = vmatprep.subr.bf16.mxu0 %v2033_v1 }
  0xdc   :  { %v147_v13 = vpop.f32.mrb[0].mxu0 }
  0xdd   :  { %v1709_v14 = vpop.f32.mrb[1].mxu0  ;;  %v148_v16 = vadd.f32 %v147_v13, %v96_v12 }
  0xde   :  { %v150_v15 = vpop.f32.mrb[2].mxu0  ;;  %v39_v14 = vld [vmem:[%s2703_s4 + $0x10] sm:$0xff] }
  0xdf   :  { %v151_v17 = vadd.f32 %v150_v15, %v96_v12  ;;  %v1710_v18 = vpop.f32.mrb[3].mxu0  ;;  %v38_v12 = vld [vmem:[%s2703_s4 + $0x8] sm:$0xff] }
  0xe1   :  { %v216_v21 = vpack.c.bf16 %v151_v17, %v148_v16 }
  0xe3   :  { %1720 = vmatpush3.bf16.msra.mxu1 %v216_v21 }
  0xe4   :  { %1741 = vmatprep.subr.bf16.mxu1 %v2033_v1 }
  0xe6   :  { %1722 = vmatmul.mubr.msk.bf16.vlgmr.msra.gmra.mrb[0].mxu1 %vm217_vm2, %v215_v22  ;;  %v42_v22 = vld [vmem:[%s2703_s4 + $0x28] sm:$0xff] }
  0xe7   :  { %1745 = vmatprep.mubr.msk.bf16.mxu1 %vm2034_vm0, %v2033_v1  ;;  %1742 = vmatpush3.bf16.msra.mxu1 %v1925_v24  ;;  %v44_v24 = vld [vmem:[%s2703_s4 + $0x38] sm:$0xff] }
  0xe8   :  { %1743 = vmatprep.subr.bf16.mxu1 %v2033_v1 }
  0xeb   :  { %1744 = vmatpush3.bf16.msra.mxu1 %v1927_v26  ;;  %v46_v26 = vld [vmem:[%s2703_s4 + $0x48] sm:$0xff] }
 0x1b9   :  { %v255_v32 = vpop.f32.mrb[0].mxu1 }
 0x1ba   :  { %v1908_v33 = vadd.f32 %v255_v32, %v161_v29  ;;  %v1723_v35 = vpop.f32.mrb[1].mxu1  ;;  %v49_v32 = vld [vmem:[%s2703_s4 + $0x60] sm:$0xff] }
 0x1bb   :  { %v258_v36 = vpop.f32.mrb[2].mxu1  ;;  %v52_v35 = vld [vmem:[%s2703_s4 + $0x78] sm:$0xff] }
 0x1bc   :  { %v266_v37 = vmul.f32 %v1908_v33, %v265_v31  ;;  %v1909_v38 = vadd.f32 %v258_v36, %v161_v29  ;;  %v1724_v39 = vpop.f32.mrb[3].mxu1  ;;  %v47_v29 = vld [vmem:[%s2703_s4 + $0x50] sm:$0xff]  ;;  %v50_v33 = vld [vmem:[%s2703_s4 + $0x68] sm:$0xff] }
 0x1bd   :  { %v2274_v36 = vld [vmem:[%s2705_s6 + $0x8] sm:$0xff] }
 0x1be   :  { %v272_v40 = vadd.f32 %v271_v34, %v266_v37  ;;  %v267_v41 = vmul.f32 %v1909_v38, %v265_v31  ;;  %v48_v31 = vld [vmem:[%s2703_s4 + $0x58] sm:$0xff]  ;;  %v2279_v37 = vld [vmem:[%s2705_s6] sm:$0xff] }
 0x1c0   :  { %v2172_v42 = vadd.f32 %v272_v40, %v2096_v3  ;;  %v273_v43 = vadd.f32 %v271_v34, %v267_v41  ;;  %v51_v34 = vld [vmem:[%s2703_s4 + $0x70] sm:$0xff] }
 0x1c2   :  { %v2175_v44 = vadd.f32 %v273_v43, %v2101_v4  ;;  %v276_v45 = vmax.f32 %v2172_v42, 0.0  ;;  %v2286_v43 = vld [vmem:[%s2705_s6 + $0x18] sm:$0xff] }
 0x1c4   :  { %v277_v46 = vmax.f32 %v2175_v44, 0.0  ;;  %v1932_v44 = vld [vmem:[%s2701_s2 + $0x60] sm:$0xff]  }
 0x1c6   :  { %v278_v48 = vpack.c.bf16 %v277_v46, %v276_v45 }
 0x1c8   :  { %1730 = vmatmul.mubr.msk.bf16.vlgmr.msra.gmra.mrb[4].mxu0 %vm109_vm1, %v278_v48  ;;  %1746 = vmatmul.mubr.msk.bf16.vlgmr.msra.gmra.mrb[4].mxu1 %vm109_vm1, %v278_v48 }
 0x1c9   :  { %1734 = vmatpush3.bf16.msra.mxu0 %v1928_v47  ;;  %1737 = vmatprep.mubr.msk.bf16.mxu0 %vm2034_vm0, %v2033_v1  ;;  %v2291_v47 = vld [vmem:[%s2705_s6 + $0x10] sm:$0xff] }
 0x1ca   :  { %1735 = vmatprep.subr.bf16.mxu0 %v2033_v1 }
 0x1cd   :  { %1736 = vmatpush3.bf16.msra.mxu0 %v1929_v49 }
 0x1d0   :  { %1738 = vmatmul.mubr.msk.bf16.vlgmr.msra.gmra.mrb[8].mxu0 %vm109_vm1, %v278_v48 }
 0x1d1   :  { %1753 = vmatprep.mubr.msk.f32.mxu0 %vm217_vm2, %v37_v50 }
 0x29b   :  { %v337_v55 = vpop.f32.mrb[4].mxu0  ;;  %v461_v56 = vpop.f32.mrb[4].mxu1 }
 0x29c   :  { %v1731_v57 = vpop.f32.mrb[5].mxu0  ;;  %v1747_v58 = vpop.f32.mrb[5].mxu1  ;;  %v338_v62 = vadd.f32 %v337_v55, %v287_v53  ;;  %v462_v63 = vadd.f32 %v461_v56, %v414_v54  ;;  %v2304_v55 = vld [vmem:[%s2705_s6 + $0x20] sm:$0xff] }
 0x29d   :  { %v340_v59 = vpop.f32.mrb[6].mxu0  ;;  %v464_v60 = vpop.f32.mrb[6].mxu1 }
 0x29e   :  { %v341_v0 = vadd.f32 %v340_v59, %v287_v53  ;;  %v465_v2 = vadd.f32 %v464_v60, %v414_v54  ;;  %v1732_v3 = vpop.f32.mrb[7].mxu0  ;;  %v1748_v4 = vpop.f32.mrb[7].mxu1  ;;  %v2299_v54 = vld [vmem:[%s2705_s6 + $0x28] sm:$0xff] }
 0x2a0   :  { %v1872_v5 = vpack.c.bf16 %v341_v0, %v338_v62  ;;  %v1026_v6 = vpack.c.bf16 %v465_v2, %v462_v63  ;;  %v2312_v62 = vld [vmem:[%s2705_s6 + $0x38] sm:$0xff]  ;;  %v2317_v63 = vld [vmem:[%s2705_s6 + $0x30] sm:$0xff] }
 0x2a2   :  { %1873 = vmatprep.subr.bf16.mxu0 %v1872_v5 }
 0x2a3   :  { %v399_v8 = vpop.f32.mrb[8].mxu0  ;;  %1875 = vmatpush3.bf16.msra.mxu0 %v1872_v5 }
 0x2a4   :  { %v1739_v13 = vpop.f32.mrb[9].mxu0  ;;  %1795 = vmatprep.subr.bf16.mxu0 %v1026_v6  ;;  %v400_v16 = vadd.f32 %v399_v8, %v352_v7 }
 0x2a5   :  { %v402_v15 = vpop.f32.mrb[10].mxu0 }
 0x2a6   :  { %v403_v17 = vadd.f32 %v402_v15, %v352_v7  ;;  %v1740_v18 = vpop.f32.mrb[11].mxu0  ;;  %1754 = vmatmul.mubr.msk.f32.vlgmr.msra.gmra.mrb[12].mxu0 %vm217_vm2, %v38_v12  ;;  %v2330_v7 = vld [vmem:[%s2705_s6 + $0x40] sm:$0xff] }
 0x2a7   :  { %1796 = vmatpush3.bf16.msra.mxu0 %v1026_v6  ;;  %1756 = vmatprep.mubr.msk.f32.mxu0 %vm217_vm2, %v39_v14  ;;  %v2325_v6 = vld [vmem:[%s2705_s6 + $0x48] sm:$0xff] }
 0x2a8   :  { %v685_v19 = vpack.c.bf16 %v403_v17, %v400_v16  ;;  %v2338_v16 = vld [vmem:[%s2705_s6 + $0x58] sm:$0xff]  ;;  %v2343_v17 = vld [vmem:[%s2705_s6 + $0x50] sm:$0xff] }
 0x2aa   :  { %1757 = vmatmul.mubr.msk.f32.gmra.mrb[14].mxu0 %vm217_vm2, %v40_v11  ;;  %1914 = vmatprep.subr.msk.bf16.mxu1 %vm109_vm1, %v685_v19  ;;  %v711_v21 = vsel %vm109_vm1, %v685_v19, 0 }
 0x2ab   :  { %1778 = vmatpush3.bf16.xpose.msra.mxu1 %v711_v21  ;;  %1759 = vmatprep.mubr.msk.f32.mxu0 %vm217_vm2, %v41_v20 }
 0x2ae   :  { %1760 = vmatmul.mubr.msk.f32.gmra.mrb[16].mxu0 %vm217_vm2, %v42_v22  ;;  %v2351_v22 = vld [vmem:[%s2705_s6 + $0x68] sm:$0xff] }
 0x2af   :  { %1762 = vmatprep.mubr.msk.f32.mxu0 %vm217_vm2, %v43_v23  ;;  %v2356_v23 = vld [vmem:[%s2705_s6 + $0x60] sm:$0xff] }
 0x2b2   :  { %1763 = vmatmul.mubr.msk.f32.gmra.mrb[18].mxu0 %vm217_vm2, %v44_v24 }
 0x2b3   :  { %1765 = vmatprep.mubr.msk.f32.mxu0 %vm217_vm2, %v45_v25 }
 0x2b6   :  { %1766 = vmatmul.mubr.msk.f32.gmra.mrb[20].mxu0 %vm217_vm2, %v46_v26 }
 0x2b7   :  { %1768 = vmatprep.mubr.msk.f32.mxu0 %vm217_vm2, %v47_v29 }
 0x2ba   :  { %1769 = vmatmul.mubr.msk.f32.gmra.mrb[22].mxu0 %vm217_vm2, %v48_v31 }
 0x2bb   :  { %1771 = vmatprep.mubr.msk.f32.mxu0 %vm217_vm2, %v49_v32  ;;  %v2364_v32 = vld [vmem:[%s2705_s6 + $0x78] sm:$0xff] }
 0x2be   :  { %1772 = vmatmul.mubr.msk.f32.gmra.mrb[24].mxu0 %vm217_vm2, %v50_v33  ;;  %v2369_v33 = vld [vmem:[%s2705_s6 + $0x70] sm:$0xff] }
 0x2bf   :  { %1774 = vmatprep.mubr.msk.f32.mxu0 %vm217_vm2, %v51_v34 }
 0x2c2   :  { %1775 = vmatmul.mubr.msk.f32.gmra.mrb[26].mxu0 %vm217_vm2, %v52_v35 }
 0x379   :  { %v1755_v38 = vpop.f32.mrb[12].mxu0 }
 0x37a   :  { %v662_v39 = vmul.f32 %v1755_v38, %v2274_v36  ;;  %v582_v40 = vpop.f32.mrb[13].mxu0 }
 0x37b   :  { %v661_v41 = vmul.f32 %v582_v40, %v2279_v37 }
 0x37d   :  { %v677_v48 = vpack.c.bf16 %v662_v39, %v661_v41  ;;  %v1758_v49 = vpop.f32.mrb[14].mxu0 }
 0x37e   :  { %v664_v50 = vmul.f32 %v1758_v49, %v2286_v43  ;;  %v592_v52 = vpop.f32.mrb[15].mxu0  ;;  %v73_v49 = vld [vmem:[%s2706_s7 + $0x10] sm:$0xff] }
 0x37f   :  { %v663_v53 = vmul.f32 %v592_v52, %v2291_v47  ;;  %1779 = vmatprep.mubr.msk.bf16.mxu1 %vm109_vm1, %v677_v48 }
 0x381   :  { %v678_v56 = vpack.c.bf16 %v664_v50, %v663_v53  ;;  %v1761_v57 = vpop.f32.mrb[16].mxu0  ;;  %v71_v53 = vld [vmem:[%s2706_s7] sm:$0xff] }
 0x382   :  { %v666_v58 = vmul.f32 %v1761_v57, %v2299_v54  ;;  %v602_v59 = vpop.f32.mrb[17].mxu0 }
 0x383   :  { %1780 = vmatmul.mubr.msk.bf16.vlgmr.msra.gmra.mrb[8].mxu1 %vm109_vm1, %v678_v56  ;;  %v665_v60 = vmul.f32 %v602_v59, %v2304_v55 }
 0x385   :  { %v679_v0 = vpack.c.bf16 %v666_v58, %v665_v60  ;;  %v1764_v2 = vpop.f32.mrb[18].mxu0  ;;  %v74_v58 = vld [vmem:[%s2706_s7 + $0x18] sm:$0xff] }
 0x386   :  { %v668_v3 = vmul.f32 %v1764_v2, %v2312_v62  ;;  %v612_v4 = vpop.f32.mrb[19].mxu0  ;;  %v72_v2 = vld [vmem:[%s2706_s7 + $0x8] sm:$0xff] }
 0x387   :  { %v667_v5 = vmul.f32 %v612_v4, %v2317_v63  ;;  %1783 = vmatprep.mubr.msk.bf16.mxu1 %vm109_vm1, %v679_v0 }
 0x389   :  { %v680_v8 = vpack.c.bf16 %v668_v3, %v667_v5  ;;  %v1767_v12 = vpop.f32.mrb[20].mxu0 }
 0x38a   :  { %v670_v13 = vmul.f32 %v1767_v12, %v2325_v6  ;;  %v622_v14 = vpop.f32.mrb[21].mxu0 }
 0x38b   :  { %1784 = vmatmul.mubr.msk.bf16.gmra.mrb[12].mxu1 %vm109_vm1, %v680_v8  ;;  %v669_v15 = vmul.f32 %v622_v14, %v2330_v7 }
 0x38d   :  { %v681_v18 = vpack.c.bf16 %v670_v13, %v669_v15  ;;  %v1770_v11 = vpop.f32.mrb[22].mxu0 }
 0x38e   :  { %v672_v19 = vmul.f32 %v1770_v11, %v2338_v16  ;;  %v632_v20 = vpop.f32.mrb[23].mxu0  ;;  %v75_v11 = vld [vmem:[%s2706_s7 + $0x20] sm:$0xff] }
 0x38f   :  { %v671_v21 = vmul.f32 %v632_v20, %v2343_v17  ;;  %1787 = vmatprep.mubr.msk.bf16.mxu1 %vm109_vm1, %v681_v18 }
 0x391   :  { %v682_v24 = vpack.c.bf16 %v672_v19, %v671_v21  ;;  %v1773_v25 = vpop.f32.mrb[24].mxu0 }
 0x392   :  { %v674_v26 = vmul.f32 %v1773_v25, %v2351_v22  ;;  %v642_v29 = vpop.f32.mrb[25].mxu0 }
 0x393   :  { %1788 = vmatmul.mubr.msk.bf16.gmra.mrb[16].mxu1 %vm109_vm1, %v682_v24  ;;  %v673_v31 = vmul.f32 %v642_v29, %v2356_v23  ;;  %v77_v29 = vld [vmem:[%s2706_s7 + $0x30] sm:$0xff] }
 0x395   :  { %v683_v34 = vpack.c.bf16 %v674_v26, %v673_v31  ;;  %v1776_v35 = vpop.f32.mrb[26].mxu0  ;;  %v76_v26 = vld [vmem:[%s2706_s7 + $0x28] sm:$0xff] }
 0x396   :  { %v676_v38 = vmul.f32 %v1776_v35, %v2364_v32  ;;  %v652_v39 = vpop.f32.mrb[27].mxu0 }
 0x397   :  { %v675_v40 = vmul.f32 %v652_v39, %v2369_v33  ;;  %1791 = vmatprep.mubr.msk.bf16.mxu1 %vm109_vm1, %v683_v34 }
 0x399   :  { %v684_v41 = vpack.c.bf16 %v676_v38, %v675_v40  ;;  %v78_v38 = vld [vmem:[%s2706_s7 + $0x38] sm:$0xff] }
 0x39b   :  { %1792 = vmatmul.mubr.msk.bf16.gmra.mrb[20].mxu1 %vm109_vm1, %v684_v41 }
 0x456   :  { %v1781_v48 = vpop.f32.mrb[8].mxu1 }
 0x457   :  { %v812_v50 = vmul.f32 0.5, %v1781_v48  ;;  %v747_v52 = vpop.f32.mrb[9].mxu1 }
 0x458   :  { %v810_v56 = vmul.f32 0.5, %v747_v52  ;;  %v1782_v57 = vpop.f32.mrb[10].mxu1 }
 0x459   :  { %v813_v59 = vmul.f32 0.5, %v1782_v57  ;;  %v750_v60 = vpop.f32.mrb[11].mxu1  ;;  %v2384_v0 = vadd.f32 %v812_v50, %v73_v49 }
 0x45a   :  { %v811_v3 = vmul.f32 0.5, %v750_v60  ;;  %v2389_v4 = vadd.f32 %v810_v56, %v71_v53  ;;  %v79_v53 = vld [vmem:[%s2706_s7 + $0x40] sm:$0xff] }
 0x45b   :  { %v848_v5 = vsel %vm217_vm2, %v2384_v0, -inf  ;;  %v2393_v8 = vadd.f32 %v813_v59, %v74_v58 }
 0x45c   :  { %849 = vmax.xlane.f32.xlu1 %v848_v5  ;;  %v842_v12 = vsel %vm217_vm2, %v2389_v4, -inf  ;;  %v2397_v13 = vadd.f32 %v811_v3, %v72_v2  ;;  %v80_v2 = vld [vmem:[%s2706_s7 + $0x48] sm:$0xff]  ;;  %v81_v3 = vld [vmem:[%s2706_s7 + $0x50] sm:$0xff] }
 0x45d   :  { %843 = vmax.xlane.f32.xlu0 %v842_v12  ;;  %v851_v18 = vsel %vm217_vm2, %v2393_v8, -inf }
 0x45e   :  { %v1785_v14 = vpop.f32.mrb[12].mxu1  ;;  %v845_v24 = vsel %vm217_vm2, %v2397_v13, -inf }
 0x45f   :  { %v763_v15 = vpop.f32.mrb[13].mxu1  ;;  %v816_v19 = vmul.f32 0.5, %v1785_v14 }
 0x460   :  { %v814_v20 = vmul.f32 0.5, %v763_v15  ;;  %852 = vmax.xlane.f32.xlu1 %v851_v18  ;;  %v1786_v21 = vpop.f32.mrb[14].mxu1  ;;  %v82_v18 = vld [vmem:[%s2706_s7 + $0x58] sm:$0xff] }
 0x461   :  { %846 = vmax.xlane.f32.xlu0 %v845_v24  ;;  %v766_v25 = vpop.f32.mrb[15].mxu1  ;;  %v817_v31 = vmul.f32 0.5, %v1786_v21  ;;  %v2421_v41 = vadd.f32 %v816_v19, %v77_v29  ;;  %v83_v29 = vld [vmem:[%s2706_s7 + $0x60] sm:$0xff] }
 0x462   :  { %v815_v34 = vmul.f32 0.5, %v766_v25  ;;  %v2412_v35 = vadd.f32 %v814_v20, %v75_v11 }
 0x463   :  { %v2425_v50 = vadd.f32 %v817_v31, %v78_v38  ;;  %v860_v59 = vsel %vm217_vm2, %v2421_v41, -inf }
 0x464   :  { %v854_v39 = vsel %vm217_vm2, %v2412_v35, -inf  ;;  %v2419_v40 = vadd.f32 %v815_v34, %v76_v26 }
 0x465   :  { %855 = vmax.xlane.f32.xlu0 %v854_v39  ;;  %v863_v14 = vsel %vm217_vm2, %v2425_v50, -inf }
 0x466   :  { %v1789_v48 = vpop.f32.mrb[16].mxu1  ;;  %v857_v49 = vsel %vm217_vm2, %v2419_v40, -inf }
 0x467   :  { %858 = vmax.xlane.f32.xlu1 %v857_v49  ;;  %v779_v52 = vpop.f32.mrb[17].mxu1  ;;  %v820_v56 = vmul.f32 0.5, %v1789_v48  ;;  %v84_v49 = vld [vmem:[%s2706_s7 + $0x68] sm:$0xff] }
 0x468   :  { %v818_v57 = vmul.f32 0.5, %v779_v52  ;;  %v1790_v58 = vpop.f32.mrb[18].mxu1  ;;  %v85_v52 = vld [vmem:[%s2706_s7 + $0x70] sm:$0xff] }
 0x469   :  { %861 = vmax.xlane.f32.xlu0 %v860_v59  ;;  %v782_v60 = vpop.f32.mrb[19].mxu1  ;;  %v821_v5 = vmul.f32 0.5, %v1790_v58  ;;  %v2449_v20 = vadd.f32 %v820_v56, %v81_v3  ;;  %v86_v59 = vld [vmem:[%s2706_s7 + $0x78] sm:$0xff] }
 0x46a   :  { %v819_v12 = vmul.f32 0.5, %v782_v60  ;;  %v2440_v15 = vadd.f32 %v818_v57, %v79_v53 }
 0x46b   :  { %864 = vmax.xlane.f32.xlu1 %v863_v14  ;;  %v2453_v25 = vadd.f32 %v821_v5, %v82_v18  ;;  %v872_v39 = vsel %vm217_vm2, %v2449_v20, -inf }
 0x46c   :  { %v866_v11 = vsel %vm217_vm2, %v2440_v15, -inf  ;;  %v2447_v19 = vadd.f32 %v819_v12, %v80_v2 }
 0x46d   :  { %867 = vmax.xlane.f32.xlu0 %v866_v11  ;;  %v875_v57 = vsel %vm217_vm2, %v2453_v25, -inf }
 0x46e   :  { %v1793_v21 = vpop.f32.mrb[20].mxu1  ;;  %v869_v24 = vsel %vm217_vm2, %v2447_v19, -inf }
 0x46f   :  { %870 = vmax.xlane.f32.xlu1 %v869_v24  ;;  %v795_v26 = vpop.f32.mrb[21].mxu1  ;;  %v824_v31 = vmul.f32 0.5, %v1793_v21 }
 0x470   :  { %v822_v34 = vmul.f32 0.5, %v795_v26  ;;  %v1794_v38 = vpop.f32.mrb[22].mxu1 }
 0x471   :  { %873 = vmax.xlane.f32.xlu0 %v872_v39  ;;  %v798_v48 = vpop.f32.mrb[23].mxu1  ;;  %v825_v53 = vmul.f32 0.5, %v1794_v38  ;;  %v2477_v3 = vadd.f32 %v824_v31, %v85_v52 }
 0x472   :  { %v823_v56 = vmul.f32 0.5, %v798_v48  ;;  %v2468_v58 = vadd.f32 %v822_v34, %v83_v29 }
 0x473   :  { %876 = vmax.xlane.f32.xlu1 %v875_v57  ;;  %v2481_v12 = vadd.f32 %v825_v53, %v86_v59  ;;  %v884_v14 = vsel %vm217_vm2, %v2477_v3, -inf }
 0x474   :  { %v878_v60 = vsel %vm217_vm2, %v2468_v58, -inf  ;;  %v2475_v2 = vadd.f32 %v823_v56, %v84_v49 }
 0x475   :  { %879 = vmax.xlane.f32.xlu0 %v878_v60  ;;  %v887_v18 = vsel %vm217_vm2, %v2481_v12, -inf }
 0x476   :  { %v881_v5 = vsel %vm217_vm2, %v2475_v2, -inf }
 0x477   :  { %882 = vmax.xlane.f32.xlu1 %v881_v5 }
 0x479   :  { %885 = vmax.xlane.f32.xlu0 %v884_v14 }
 0x47b   :  { %888 = vmax.xlane.f32.xlu1 %v887_v18 }
 0x4e9   :  { %v850_v11 = vpop.xlane.xlu1 %849 }
 0x4ea   :  { %v892_v21 = vsub.f32 %v2384_v0, %v850_v11  ;;  %v844_v24 = vpop.xlane.xlu0 %843 }
 0x4eb   :  { %v890_v26 = vsub.f32 %v2389_v4, %v844_v24 }
 0x4ec   :  { %v910_v29 = vmul.f32 1.442695, %v892_v21 }
 0x4ed   :  { %v906_v31 = vmul.f32 1.442695, %v890_v26  ;;  %v853_v34 = vpop.xlane.xlu1 %852 }
 0x4ee   :  { %v893_v38 = vsub.f32 %v2393_v8, %v853_v34  ;;  %v847_v39 = vpop.xlane.xlu0 %846 }
 0x4ef   :  { %1936 = vpow2.f32 %v906_v31  ;;  %v891_v48 = vsub.f32 %v2397_v13, %v847_v39 }
 0x4f0   :  { %1938 = vpow2.f32 %v910_v29  ;;  %v912_v49 = vmul.f32 1.442695, %v893_v38 }
 0x4f1   :  { %v908_v52 = vmul.f32 1.442695, %v891_v48 }
 0x4f2   :  { %v856_v53 = vpop.xlane.xlu0 %855 }
 0x4f3   :  { %1940 = vpow2.f32 %v908_v52  ;;  %v894_v56 = vsub.f32 %v2412_v35, %v856_v53 }
 0x4f4   :  { %v859_v0 = vpop.xlane.xlu1 %858  ;;  %1942 = vpow2.f32 %v912_v49 }
 0x4f5   :  { %v914_v57 = vmul.f32 1.442695, %v894_v56  ;;  %v895_v4 = vsub.f32 %v2419_v40, %v859_v0 }
 0x4f6   :  { %v862_v59 = vpop.xlane.xlu0 %861 }
 0x4f7   :  { %1944 = vpow2.f32 %v914_v57  ;;  %v916_v60 = vmul.f32 1.442695, %v895_v4  ;;  %v896_v8 = vsub.f32 %v2421_v41, %v862_v59 }
 0x4f8   :  { %v865_v5 = vpop.xlane.xlu1 %864 }
 0x4f9   :  { %v2494_v14 = vpop.eup %1936  ;;  %1946 = vpow2.f32 %v916_v60  ;;  %v918_v13 = vmul.f32 1.442695, %v896_v8  ;;  %v897_v18 = vsub.f32 %v2425_v50, %v865_v5 }
 0x4fa   :  { %v868_v11 = vpop.xlane.xlu0 %867  ;;  %v938_v35 = vsel %vm217_vm2, %v2494_v14, 0.0  ;;  %v2499_v21 = vpop.eup %1938 }
 0x4fb   :  { %1948 = vpow2.f32 %v918_v13  ;;  %v920_v40 = vmul.f32 1.442695, %v897_v18  ;;  %v898_v24 = vsub.f32 %v2440_v15, %v868_v11  ;;  %939 = vadd.xlane.f32.xlu0 %v938_v35  ;;  %v944_v50 = vsel %vm217_vm2, %v2499_v21, 0.0 }
 0x4fc   :  { %v871_v26 = vpop.xlane.xlu1 %870 }
 0x4fd   :  { %v2502_v41 = vpop.eup %1940  ;;  %1950 = vpow2.f32 %v920_v40  ;;  %v922_v29 = vmul.f32 1.442695, %v898_v24  ;;  %v899_v31 = vsub.f32 %v2447_v19, %v871_v26 }
 0x4fe   :  { %v874_v34 = vpop.xlane.xlu0 %873  ;;  %v941_v38 = vsel %vm217_vm2, %v2502_v41, 0.0  ;;  %v2509_v39 = vpop.eup %1942 }
 0x4ff   :  { %1952 = vpow2.f32 %v922_v29  ;;  %v924_v48 = vmul.f32 1.442695, %v899_v31  ;;  %v900_v15 = vsub.f32 %v2449_v20, %v874_v34  ;;  %945 = vadd.xlane.f32.xlu0 %v944_v50  ;;  %942 = vadd.xlane.f32.xlu1 %v941_v38  ;;  %v947_v57 = vsel %vm217_vm2, %v2509_v39, 0.0 }
 0x500   :  { %v877_v49 = vpop.xlane.xlu1 %876 }
 0x501   :  { %v2512_v52 = vpop.eup %1944  ;;  %1954 = vpow2.f32 %v924_v48  ;;  %v926_v19 = vmul.f32 1.442695, %v900_v15  ;;  %v901_v53 = vsub.f32 %v2453_v25, %v877_v49 }
 0x502   :  { %v880_v56 = vpop.xlane.xlu0 %879  ;;  %v950_v0 = vsel %vm217_vm2, %v2512_v52, 0.0 }
 0x503   :  { %v2519_v4 = vpop.eup %1946  ;;  %1956 = vpow2.f32 %v926_v19  ;;  %v928_v20 = vmul.f32 1.442695, %v901_v53  ;;  %v902_v59 = vsub.f32 %v2468_v58, %v880_v56  ;;  %951 = vadd.xlane.f32.xlu0 %v950_v0  ;;  %948 = vadd.xlane.f32.xlu1 %v947_v57 }
 0x504   :  { %v883_v60 = vpop.xlane.xlu1 %882  ;;  %v953_v11 = vsel %vm217_vm2, %v2519_v4, 0.0 }
 0x505   :  { %v2522_v8 = vpop.eup %1948  ;;  %1958 = vpow2.f32 %v928_v20  ;;  %v930_v25 = vmul.f32 1.442695, %v902_v59  ;;  %v903_v5 = vsub.f32 %v2475_v2, %v883_v60 }
 0x506   :  { %v886_v13 = vpop.xlane.xlu0 %885  ;;  %v956_v18 = vsel %vm217_vm2, %v2522_v8, 0.0 }
 0x507   :  { %v2529_v35 = vpop.eup %1950  ;;  %1960 = vpow2.f32 %v930_v25  ;;  %v932_v58 = vmul.f32 1.442695, %v903_v5  ;;  %v904_v40 = vsub.f32 %v2477_v3, %v886_v13  ;;  %957 = vadd.xlane.f32.xlu0 %v956_v18  ;;  %954 = vadd.xlane.f32.xlu1 %v953_v11 }
 0x508   :  { %v889_v24 = vpop.xlane.xlu1 %888  ;;  %v959_v34 = vsel %vm217_vm2, %v2529_v35, 0.0 }
 0x509   :  { %v2532_v26 = vpop.eup %1952  ;;  %1962 = vpow2.f32 %v932_v58  ;;  %v934_v2 = vmul.f32 1.442695, %v904_v40  ;;  %v905_v29 = vsub.f32 %v2481_v12, %v889_v24 }
 0x50a   :  { %v962_v31 = vsel %vm217_vm2, %v2532_v26, 0.0 }
 0x50b   :  { %v2539_v50 = vpop.eup %1954  ;;  %1964 = vpow2.f32 %v934_v2  ;;  %v936_v38 = vmul.f32 1.442695, %v905_v29  ;;  %963 = vadd.xlane.f32.xlu0 %v962_v31  ;;  %960 = vadd.xlane.f32.xlu1 %v959_v34 }
 0x50c   :  { %v965_v12 = vsel %vm217_vm2, %v2539_v50, 0.0 }
 0x50d   :  { %v2541_v3 = vpop.eup %1956  ;;  %1966 = vpow2.f32 %v936_v38 }
 0x50e   :  { %v968_v48 = vsel %vm217_vm2, %v2541_v3, 0.0 }
 0x50f   :  { %v2547_v15 = vpop.eup %1958  ;;  %969 = vadd.xlane.f32.xlu0 %v968_v48  ;;  %966 = vadd.xlane.f32.xlu1 %v965_v12 }
 0x510   :  { %v971_v53 = vsel %vm217_vm2, %v2547_v15, 0.0 }
 0x511   :  { %v2549_v49 = vpop.eup %1960 }
 0x512   :  { %v974_v19 = vsel %vm217_vm2, %v2549_v49, 0.0 }
 0x513   :  { %v2555_v56 = vpop.eup %1962  ;;  %975 = vadd.xlane.f32.xlu0 %v974_v19  ;;  %972 = vadd.xlane.f32.xlu1 %v971_v53 }
 0x514   :  { %v977_v20 = vsel %vm217_vm2, %v2555_v56, 0.0 }
 0x515   :  { %v2557_v0 = vpop.eup %1964 }
 0x516   :  { %v980_v57 = vsel %vm217_vm2, %v2557_v0, 0.0 }
 0x517   :  { %v2563_v59 = vpop.eup %1966  ;;  %981 = vadd.xlane.f32.xlu0 %v980_v57  ;;  %978 = vadd.xlane.f32.xlu1 %v977_v20 }
 0x518   :  { %v983_v60 = vsel %vm217_vm2, %v2563_v59, 0.0 }
 0x51b   :  { %984 = vadd.xlane.f32.xlu1 %v983_v60 }
 0x588   :  { %v940_v25 = vpop.xlane.xlu0 %939 }
 0x589   :  { %1968 = vrcp.f32 %v940_v25 }
 0x58c   :  { %v946_v5 = vpop.xlane.xlu0 %945  ;;  %v943_v13 = vpop.xlane.xlu1 %942 }
 0x58d   :  { %1970 = vrcp.f32 %v943_v13 }
 0x58e   :  { %1972 = vrcp.f32 %v946_v5 }
 0x590   :  { %v952_v18 = vpop.xlane.xlu0 %951  ;;  %v949_v11 = vpop.xlane.xlu1 %948 }
 0x591   :  { %1974 = vrcp.f32 %v949_v11 }
 0x592   :  { %1976 = vrcp.f32 %v952_v18 }
 0x593   :  { %v1969_v24 = vpop.eup %1968 }
 0x594   :  { %v958_v58 = vpop.xlane.xlu0 %957  ;;  %v955_v40 = vpop.xlane.xlu1 %954  ;;  %v1002_v34 = vmul.f32 %v1969_v24, %v2494_v14 }
 0x595   :  { %1978 = vrcp.f32 %v955_v40 }
 0x596   :  { %1980 = vrcp.f32 %v958_v58 }
 0x597   :  { %v1971_v2 = vpop.eup %1970 }
 0x598   :  { %v964_v29 = vpop.xlane.xlu0 %963  ;;  %v961_v31 = vpop.xlane.xlu1 %960  ;;  %v1003_v38 = vmul.f32 %v1971_v2, %v2502_v41 }
 0x599   :  { %v1973_v48 = vpop.eup %1972  ;;  %1982 = vrcp.f32 %v961_v31 }
 0x59a   :  { %v1018_v12 = vpack.c.bf16 %v1003_v38, %v1002_v34  ;;  %1984 = vrcp.f32 %v964_v29  ;;  %v1004_v20 = vmul.f32 %v1973_v48, %v2499_v21 }
 0x59b   :  { %v1975_v19 = vpop.eup %1974 }
 0x59c   :  { %v970_v53 = vpop.xlane.xlu0 %969  ;;  %v967_v57 = vpop.xlane.xlu1 %966  ;;  %v1005_v60 = vmul.f32 %v1975_v19, %v2509_v39  ;;  %1797 = vmatprep.mubr.msk.bf16.mxu0 %vm217_vm2, %v1018_v12 }
 0x59d   :  { %v1977_v25 = vpop.eup %1976  ;;  %1986 = vrcp.f32 %v967_v57 }
 0x59e   :  { %v1019_v5 = vpack.c.bf16 %v1005_v60, %v1004_v20  ;;  %1988 = vrcp.f32 %v970_v53  ;;  %v1006_v18 = vmul.f32 %v1977_v25, %v2512_v52 }
 0x59f   :  { %v1979_v13 = vpop.eup %1978 }
 0x5a0   :  { %v976_v14 = vpop.xlane.xlu0 %975  ;;  %v973_v41 = vpop.xlane.xlu1 %972  ;;  %1798 = vmatmul.mubr.msk.bf16.vlgmr.msra.gmra.mrb[28].mxu0 %vm217_vm2, %v1019_v5  ;;  %v1007_v11 = vmul.f32 %v1979_v13, %v2519_v4 }
 0x5a1   :  { %v1981_v58 = vpop.eup %1980  ;;  %1990 = vrcp.f32 %v973_v41 }
 0x5a2   :  { %v1020_v21 = vpack.c.bf16 %v1007_v11, %v1006_v18  ;;  %1992 = vrcp.f32 %v976_v14  ;;  %v1008_v2 = vmul.f32 %v1981_v58, %v2522_v8 }
 0x5a3   :  { %v1983_v40 = vpop.eup %1982 }
 0x5a4   :  { %v982_v39 = vpop.xlane.xlu0 %981  ;;  %v979_v24 = vpop.xlane.xlu1 %978  ;;  %1801 = vmatprep.mubr.msk.bf16.mxu0 %vm217_vm2, %v1020_v21  ;;  %v1009_v29 = vmul.f32 %v1983_v40, %v2529_v35 }
 0x5a5   :  { %v1985_v31 = vpop.eup %1984  ;;  %1994 = vrcp.f32 %v979_v24 }
 0x5a6   :  { %1996 = vrcp.f32 %v982_v39  ;;  %v1021_v34 = vpack.c.bf16 %v1009_v29, %v1008_v2  ;;  %v1010_v4 = vmul.f32 %v1985_v31, %v2532_v26 }
 0x5a7   :  { %v1987_v52 = vpop.eup %1986 }
 0x5a8   :  { %v985_v38 = vpop.xlane.xlu1 %984  ;;  %1802 = vmatmul.mubr.msk.bf16.gmra.mrb[32].mxu0 %vm217_vm2, %v1021_v34  ;;  %v1011_v48 = vmul.f32 %v1987_v52, %v2539_v50  ;;  %v1989_v12 = vpop.eup %1988 }
 0x5a9   :  { %1998 = vrcp.f32 %v985_v38  ;;  %v1012_v8 = vmul.f32 %v1989_v12, %v2541_v3 }
 0x5aa   :  { %v1022_v19 = vpack.c.bf16 %v1011_v48, %v1010_v4 }
 0x5ab   :  { %v1991_v53 = vpop.eup %1990 }
 0x5ac   :  { %1805 = vmatprep.mubr.msk.bf16.mxu0 %vm217_vm2, %v1022_v19  ;;  %v1013_v35 = vmul.f32 %v1991_v53, %v2547_v15  ;;  %v1993_v57 = vpop.eup %1992  ;;  %v53_v15 = vld [vmem:[%s2704_s5] sm:$0xff] }
 0x5ad   :  { %v1014_v5 = vmul.f32 %v1993_v57, %v2549_v49  ;;  %1845 = vmatprep.mubr.f32.mxu1 %v53_v15 }
 0x5ae   :  { %v1023_v20 = vpack.c.bf16 %v1013_v35, %v1012_v8 }
 0x5af   :  { %v1995_v60 = vpop.eup %1994 }
 0x5b0   :  { %v1997_v25 = vpop.eup %1996  ;;  %1806 = vmatmul.mubr.msk.bf16.gmra.mrb[36].mxu0 %vm217_vm2, %v1023_v20  ;;  %v1015_v26 = vmul.f32 %v1995_v60, %v2555_v56 }
 0x5b1   :  { %v1016_v14 = vmul.f32 %v1997_v25, %v2557_v0 }
 0x5b2   :  { %v1024_v13 = vpack.c.bf16 %v1015_v26, %v1014_v5  ;;  %v54_v5 = vld [vmem:[%s2704_s5 + $0x8] sm:$0xff] }
 0x5b3   :  { %v1999_v50 = vpop.eup %1998 }
 0x5b4   :  { %v1017_v41 = vmul.f32 %v1999_v50, %v2563_v59  ;;  %1809 = vmatprep.mubr.msk.bf16.mxu0 %vm217_vm2, %v1024_v13  ;;  %v1247_v50 = vsub.s32 7, %v2123_v9  ;;  %v2008_v13 = vld [vmem:[%s2702_s3] sm:$0xff] }
 0x5b6   :  { %v1025_v3 = vpack.c.bf16 %v1017_v41, %v1016_v14  ;;  %v1248_v14 = vrot.slane %v2008_v13, %v1247_v50 }
 0x5b8   :  { %1810 = vmatmul.mubr.msk.bf16.gmra.mrb[40].mxu0 %vm217_vm2, %v1025_v3 }
 0x673   :  { %v1799_v18 = vpop.f32.mrb[28].mxu0 }
 0x674   :  { %v1085_v49 = vpop.f32.mrb[29].mxu0  ;;  %v1150_v56 = vmul.f32 %v1799_v18, %v2291_v47 }
 0x675   :  { %v1800_v11 = vpop.f32.mrb[30].mxu0  ;;  %v1148_v59 = vmul.f32 %v1085_v49, %v2279_v37 }
 0x676   :  { %v1151_v58 = vmul.f32 %v1800_v11, %v2286_v43  ;;  %v1088_v0 = vpop.f32.mrb[31].mxu0 }
 0x677   :  { %v1149_v21 = vmul.f32 %v1088_v0, %v2274_v36 }
 0x678   :  { %v1880_v40 = vpack.c.bf16 %v1151_v58, %v1150_v56 }
 0x679   :  { %v1876_v39 = vpack.c.bf16 %v1149_v21, %v1148_v59 }
 0x67b   :  { %v1803_v24 = vpop.f32.mrb[32].mxu0  ;;  %1877 = vmatprep.subr.bf16.mxu1 %v1876_v39 }
 0x67c   :  { %v1101_v2 = vpop.f32.mrb[33].mxu0  ;;  %1879 = vmatpush3.bf16.msra.mxu1 %v1876_v39  ;;  %v1154_v31 = vmul.f32 %v1803_v24, %v2317_v63 }
 0x67d   :  { %v1804_v29 = vpop.f32.mrb[34].mxu0  ;;  %1881 = vmatprep.subr.bf16.mxu1 %v1880_v40  ;;  %v1152_v43 = vmul.f32 %v1101_v2, %v2304_v55 }
 0x67e   :  { %v1155_v34 = vmul.f32 %v1804_v29, %v2312_v62  ;;  %v1104_v47 = vpop.f32.mrb[35].mxu0 }
 0x67f   :  { %v1153_v52 = vmul.f32 %v1104_v47, %v2299_v54 }
 0x680   :  { %v1888_v37 = vpack.c.bf16 %v1155_v34, %v1154_v31  ;;  %1883 = vmatpush3.bf16.msra.mxu1 %v1880_v40 }
 0x681   :  { %v1884_v36 = vpack.c.bf16 %v1153_v52, %v1152_v43 }
 0x683   :  { %v1807_v38 = vpop.f32.mrb[36].mxu0  ;;  %1885 = vmatprep.subr.bf16.mxu1 %v1884_v36 }
 0x684   :  { %v1117_v4 = vpop.f32.mrb[37].mxu0  ;;  %1887 = vmatpush3.bf16.msra.mxu1 %v1884_v36  ;;  %v1158_v12 = vmul.f32 %v1807_v38, %v2343_v17 }
 0x685   :  { %v1808_v48 = vpop.f32.mrb[38].mxu0  ;;  %1889 = vmatprep.subr.bf16.mxu1 %v1888_v37  ;;  %v1156_v62 = vmul.f32 %v1117_v4, %v2330_v7  ;;  %v2650_v4 = vld [vmem:[%s2702_s3 + $0x8] sm:$0xff] }
 0x686   :  { %v1159_v63 = vmul.f32 %v1808_v48, %v2338_v16  ;;  %v1120_v19 = vpop.f32.mrb[39].mxu0  ;;  %v1337_v48 = vrot.slane %v2650_v4, %v264_v28  ;;  %v1934_v28 = vld [vmem:[%s2701_s2 + $0x70] sm:$0xff]  }
 0x687   :  { %v1157_v55 = vmul.f32 %v1120_v19, %v2325_v6 }
 0x688   :  { %v1896_v53 = vpack.c.bf16 %v1159_v63, %v1158_v12  ;;  %1891 = vmatpush3.bf16.msra.mxu1 %v1888_v37  ;;  %v1343_v63 = vrot.slane %v2650_v4, %v270_v30  ;;  %v1935_v30 = vld [vmem:[%s2701_s2 + $0x78] sm:$0xff]  }
 0x689   :  { %v1892_v54 = vpack.c.bf16 %v1157_v55, %v1156_v62 }
 0x68b   :  { %v1811_v8 = vpop.f32.mrb[40].mxu0  ;;  %1893 = vmatprep.subr.bf16.mxu1 %v1892_v54 }
 0x68c   :  { %v1133_v35 = vpop.f32.mrb[41].mxu0  ;;  %1895 = vmatpush3.bf16.msra.mxu1 %v1892_v54  ;;  %v1162_v20 = vmul.f32 %v1811_v8, %v2369_v33 }
 0x68d   :  { %v1812_v57 = vpop.f32.mrb[42].mxu0  ;;  %1897 = vmatprep.subr.bf16.mxu1 %v1896_v53  ;;  %v1160_v16 = vmul.f32 %v1133_v35, %v2356_v23 }
 0x68e   :  { %v1163_v17 = vmul.f32 %v1812_v57, %v2364_v32  ;;  %v1136_v60 = vpop.f32.mrb[43].mxu0  ;;  %v1930_v32 = vld [vmem:[%s2701_s2 + $0x50] sm:$0xff]  }
 0x68f   :  { %v1161_v7 = vmul.f32 %v1136_v60, %v2351_v22  ;;  %v1931_v22 = vld [vmem:[%s2701_s2 + $0x58] sm:$0xff]  }
 0x690   :  { %v1904_v25 = vpack.c.bf16 %v1163_v17, %v1162_v20  ;;  %1899 = vmatpush3.bf16.msra.mxu1 %v1896_v53  ;;  %v1355_v20 = vrot.slane %v2650_v4, %v160_v27 }
 0x691   :  { %v1900_v6 = vpack.c.bf16 %v1161_v7, %v1160_v16 }
 0x693   :  { %1901 = vmatprep.subr.bf16.mxu1 %v1900_v6 }
 0x694   :  { %1903 = vmatpush3.bf16.msra.mxu1 %v1900_v6 }
 0x695   :  { %1905 = vmatprep.subr.bf16.mxu1 %v1904_v25 }
 0x698   :  { %1907 = vmatpush3.bf16.msra.mxu1 %v1904_v25 }
 0x699   :  { %1848 = vmatprep.subr.bf16.mxu1 %v2033_v1 }
 0x69b   :  { %1846 = vmatmul.mubr.f32.vlgmr.msra.gmra.mrb[24].mxu1 %v54_v5 }
 0x69c   :  { %1849 = vmatpush3.bf16.msra.mxu1 %v1930_v32  ;;  %1852 = vmatprep.mubr.msk.bf16.mxu1 %vm2034_vm0, %v2033_v1 }
 0x69d   :  { %1850 = vmatprep.subr.bf16.mxu1 %v2033_v1 }
 0x6a0   :  { %1851 = vmatpush3.bf16.msra.mxu1 %v1931_v22 }
 0x6a1   :  { %1856 = vmatprep.subr.bf16.mxu1 %v2033_v1 }
 0x76e   :  { %v1847_v23 = vpop.f32.mrb[24].mxu1 }
 0x76f   :  { %v1230_v33 = vpop.f32.mrb[25].mxu1 }
 0x770   :  { %v1239_v26 = vpack.c.bf16 %v1847_v23, %v1230_v33 }
 0x772   :  { %1853 = vmatmul.mubr.msk.bf16.vlgmr.msra.gmra.mrb[28].mxu1 %vm109_vm1, %v1239_v26 }
 0x773   :  { %1860 = vmatprep.mubr.msk.bf16.mxu1 %vm2034_vm0, %v2033_v1  ;;  %1857 = vmatpush3.bf16.msra.mxu1 %v1932_v44  ;;  %v1517_v44 = vrot.slane %v2650_v4, %v351_v61 }
 0x774   :  { %1858 = vmatprep.subr.bf16.mxu1 %v2033_v1 }
 0x845   :  { %v1298_v41 = vpop.f32.mrb[28].mxu1 }
 0x846   :  { %v1299_v3 = vadd.f32 %v1298_v41, %v1248_v14  ;;  %v1854_v15 = vpop.f32.mrb[29].mxu1 }
 0x847   :  { %v1301_v18 = vpop.f32.mrb[30].mxu1 }
 0x848   :  { %v1302_v49 = vadd.f32 %v1301_v18, %v1248_v14  ;;  %v1305_v11 = vadd.f32 %v1299_v3, %v276_v45  ;;  %v1855_v56 = vpop.f32.mrb[31].mxu1 }
 0x84a   :  { %v1307_v58 = vsel %vm109_vm1, %v1305_v11, 0.0  ;;  %v1306_v0 = vadd.f32 %v1302_v49, %v277_v46  ;;  %v1933_v46 = vld [vmem:[%s2701_s2 + $0x68] sm:$0xff]   ;;  %s2035_s2 = smov [#allocation2]  }
 0x84b   :  { %1308 = vadd.xlane.f32.xlu0 %v1307_v58  ;;  %1859 = vmatpush3.bf16.msra.mxu1 %v1933_v46  ;;  %s1527_s22 = sshll.u32 %s2035_s2, 4  ;;  %s1528_s22 = int_to_ptr.vmem [resolvable:$true] %s1527_s22 }
 0x84c   :  { %v1310_v59 = vsel %vm109_vm1, %v1306_v0, 0.0  ;;  %1864 = vmatprep.subr.bf16.mxu1 %v2033_v1  ;;  %s2009_s4 = scalar_lea.vmem %s1528_s22, 256  ;;  %p2014_p1 = scmp.lt.s32.totalorder %s1528_s22, %s1528_s22 }
 0x84d   :  { %1311 = vadd.xlane.f32.xlu1 %v1310_v59  ;;  %p2010_p0 = scmp.ne.s32.totalorder %s1528_s22, %s2009_s4  ;;  %p2015_p2 = scmp.lt.s32.totalorder %s2009_s4, %s2009_s4 }
 0x84f   :  { %p2016_p3 = por %p2015_p2, %p2014_p1 }
 0x851   :  { %p2017_p4 = pnand %p2016_p3, %p2010_p0 }
 0x8d8   :  { %v1309_v21 = vpop.xlane.xlu0 %1308 }
 0x8d9   :  { %v1314_v40 = vmul.f32 0.03125, %v1309_v21 }
 0x8da   :  { %v1312_v39 = vpop.xlane.xlu1 %1311 }
 0x8db   :  { %v1316_v24 = vsub.f32 %v1305_v11, %v1314_v40  ;;  %v1315_v2 = vmul.f32 0.03125, %v1312_v39 }
 0x8dd   :  { %v1317_v29 = vsub.f32 %v1306_v0, %v1315_v2  ;;  %v1318_v31 = vmul.f32 %v1316_v24, %v1316_v24 }
 0x8df   :  { %v1320_v42 = vsel %vm109_vm1, %v1318_v31, 0.0  ;;  %v1319_v45 = vmul.f32 %v1317_v29, %v1317_v29 }
 0x8e0   :  { %1321 = vadd.xlane.f32.xlu0 %v1320_v42 }
 0x8e1   :  { %v1323_v34 = vsel %vm109_vm1, %v1319_v45, 0.0  ;;  %v1511_v45 = vrot.slane %v2650_v4, %v286_v51 }
 0x8e2   :  { %1324 = vadd.xlane.f32.xlu1 %v1323_v34 }
 0x96d   :  { %v1322_v47 = vpop.xlane.xlu0 %1321 }
 0x96e   :  { %v1326_v43 = vmul.f32 0.03125, %v1322_v47 }
 0x96f   :  { %v1325_v52 = vpop.xlane.xlu1 %1324 }
 0x970   :  { %v1328_v37 = vadd.f32 1e-05, %v1326_v43  ;;  %v1327_v36 = vmul.f32 0.03125, %v1325_v52 }
 0x972   :  { %2000 = vrsqrt.f32 %v1328_v37  ;;  %v1329_v38 = vadd.f32 1e-05, %v1327_v36 }
 0x974   :  { %2002 = vrsqrt.f32 %v1329_v38 }
 0x97c   :  { %v2001_v12 = vpop.eup %2000 }
 0x97d   :  { %v1332_v19 = vmul.f32 %v2001_v12, %v1316_v24 }
 0x97e   :  { %v2003_v62 = vpop.eup %2002 }
 0x97f   :  { %v1338_v55 = vmul.f32 %v1337_v48, %v1332_v19  ;;  %v1333_v53 = vmul.f32 %v2003_v62, %v1317_v29 }
 0x981   :  { %v1339_v54 = vmul.f32 %v1337_v48, %v1333_v53  ;;  %v1344_v8 = vadd.f32 %v1343_v63, %v1338_v55 }
 0x983   :  { %v1345_v35 = vadd.f32 %v1343_v63, %v1339_v54 }
 0x985   :  { %v1346_v57 = vpack.c.bf16 %v1345_v35, %v1344_v8 }
 0x987   :  { %1861 = vmatmul.mubr.msk.bf16.vlgmr.msra.gmra.mrb[32].mxu1 %vm109_vm1, %v1346_v57 }
 0x988   :  { %1868 = vmatprep.mubr.msk.bf16.mxu1 %vm2034_vm0, %v2033_v1  ;;  %1865 = vmatpush3.bf16.msra.mxu1 %v1934_v28 }
 0x989   :  { %1866 = vmatprep.subr.bf16.mxu1 %v2033_v1  ;;  %v1423_v1 = vrot.slane %v2650_v4, %v95_v10 }
 0x98c   :  { %1867 = vmatpush3.bf16.msra.mxu1 %v1935_v30 }
 0xa5a   :  { %v1405_v17 = vpop.f32.mrb[32].mxu1 }
 0xa5b   :  { %v1406_v60 = vadd.f32 %v1405_v17, %v1355_v20  ;;  %v1862_v16 = vpop.f32.mrb[33].mxu1 }
 0xa5c   :  { %v1408_v7 = vpop.f32.mrb[34].mxu1 }
 0xa5d   :  { %v1409_v25 = vadd.f32 %v1408_v7, %v1355_v20  ;;  %v1863_v6 = vpop.f32.mrb[35].mxu1  ;;  %v1412_v5 = vmax.f32 %v1406_v60, 0.0 }
 0xa5f   :  { %v1413_v32 = vmax.f32 %v1409_v25, 0.0 }
 0xa61   :  { %v1414_v22 = vpack.c.bf16 %v1413_v32, %v1412_v5 }
 0xa63   :  { %1869 = vmatmul.mubr.msk.bf16.vlgmr.msra.gmra.mrb[36].mxu1 %vm109_vm1, %v1414_v22 }
 0xb36   :  { %v1473_v23 = vpop.f32.mrb[36].mxu1 }
 0xb37   :  { %v1474_v33 = vadd.f32 %v1473_v23, %v1423_v1  ;;  %v1870_v26 = vpop.f32.mrb[37].mxu1 }
 0xb38   :  { %v1476_v50 = vpop.f32.mrb[38].mxu1 }
 0xb39   :  { %v1477_v27 = vadd.f32 %v1476_v50, %v1423_v1  ;;  %v1871_v13 = vpop.f32.mrb[39].mxu1  ;;  %v1480_v14 = vadd.f32 %v1474_v33, %v1344_v8 }
 0xb3b   :  { %v1482_v41 = vsel %vm109_vm1, %v1480_v14, 0.0  ;;  %v1481_v3 = vadd.f32 %v1477_v27, %v1345_v35 }
 0xb3c   :  { %1483 = vadd.xlane.f32.xlu0 %v1482_v41 }
 0xb3d   :  { %v1485_v15 = vsel %vm109_vm1, %v1481_v3, 0.0 }
 0xb3e   :  { %1486 = vadd.xlane.f32.xlu1 %v1485_v15 }
 0xbc9   :  { %v1484_v18 = vpop.xlane.xlu0 %1483 }
 0xbca   :  { %v1488_v49 = vmul.f32 0.03125, %v1484_v18 }
 0xbcb   :  { %v1487_v11 = vpop.xlane.xlu1 %1486 }
 0xbcc   :  { %v1490_v56 = vsub.f32 %v1480_v14, %v1488_v49  ;;  %v1489_v58 = vmul.f32 0.03125, %v1487_v11 }
 0xbce   :  { %v1491_v10 = vsub.f32 %v1481_v3, %v1489_v58  ;;  %v1492_v0 = vmul.f32 %v1490_v56, %v1490_v56 }
 0xbd0   :  { %v1494_v59 = vsel %vm109_vm1, %v1492_v0, 0.0  ;;  %v1493_v21 = vmul.f32 %v1491_v10, %v1491_v10 }
 0xbd1   :  { %1495 = vadd.xlane.f32.xlu0 %v1494_v59 }
 0xbd2   :  { %v1497_v40 = vsel %vm109_vm1, %v1493_v21, 0.0 }
 0xbd3   :  { %1498 = vadd.xlane.f32.xlu1 %v1497_v40 }
 0xc5e   :  { %v1496_v39 = vpop.xlane.xlu0 %1495 }
 0xc5f   :  { %v1500_v24 = vmul.f32 0.03125, %v1496_v39 }
 0xc60   :  { %v1499_v2 = vpop.xlane.xlu1 %1498 }
 0xc61   :  { %v1502_v29 = vadd.f32 1e-05, %v1500_v24  ;;  %v1501_v31 = vmul.f32 0.03125, %v1499_v2 }
 0xc63   :  { %2004 = vrsqrt.f32 %v1502_v29  ;;  %v1503_v42 = vadd.f32 1e-05, %v1501_v31 }
 0xc65   :  { %2006 = vrsqrt.f32 %v1503_v42 }
 0xc6d   :  { %v2005_v34 = vpop.eup %2004 }
 0xc6e   :  { %v1506_v46 = vmul.f32 %v2005_v34, %v1490_v56 }
 0xc6f   :  { %v2007_v47 = vpop.eup %2006 }
 0xc70   :  { %v1507_v43 = vmul.f32 %v2007_v47, %v1491_v10  ;;  %v1512_v52 = vmul.f32 %v1511_v45, %v1506_v46 }
 0xc72   :  { %v1513_v37 = vmul.f32 %v1511_v45, %v1507_v43  ;;  %v1518_v36 = vadd.f32 %v1517_v44, %v1512_v52 }
 0xc74   :  { %v1519_v38 = vadd.f32 %v1517_v44, %v1513_v37  ;;  %1520 = vst.msk [vmem:[#allocation2] sm:$0xff] %vm109_vm1, %v1518_v36 }
 0xc76   :  { %1521 = vst.msk [vmem:[#allocation2 + $0x8] sm:$0xff] %vm109_vm1, %v1519_v38 }
 0xc77   :  { %2020 = shalt.err (!%p2017_p4)
}
 0xc78   :  { %s2021_s25 = scalar_lea.hbm %s2707_s8, 256 }
 0xc79   :  { %p2022_p5 = scmp.ne.s32.totalorder %s2707_s8, %s2021_s25  ;;  %p2025_p6 = scmp.lt.u32.totalorder %s2021_s25, %s2707_s8 }
 0xc7b   :  { %p2027_p7 = pnand %p2025_p6, %p2022_p5 }
 0xc7d   :  { %2030 = shalt.err (!%p2027_p7)
}
 0xc7e   :  { %s2036_s7 = smov 128   ;;  %s2037_s28 = smov 8  }
 0xc7f   :  { %1533 = dma.vmem_to_hbm [thread:$0]  %s1528_s22, 256, %s2707_s8, [#allocation3], %s2036_s7, %s2036_s7, %s2037_s28  }
 0xc80   :  { %2031 = dma.done.wait [#allocation3], 256  }
 0xc81   :  { %2032 = vsyncadd [#allocation3], 4294967040 }
 0xc82   :  { %1537 = vsyncpa [#allocation3], 1 }

</bundles_post_ra>
